<compile_context>
chip_gen: v7x
topology: tpu7x:2x2x1
jax: 0.10.0
libtpu: 0.0.40
codegen_flags: <defaults>
</compile_context>

<pallas_src>
import jax
import jax.numpy as jnp
from jax.experimental import pallas as pl
from jax.experimental.pallas import tpu as pltpu


def _shuffle_kernel(x_ref, o_ref):
    # x_ref: (1, g, Bq, hw) VMEM tile (g strided stripes of the input).
    # o_ref: (1, Bq*g, hw) VMEM tile (Bq*g *contiguous* destination channels).
    # out channel (q*g + r) <- in (group r, channel-in-group q), i.e. a
    # transpose of the two leading axes followed by a merge into the sublane dim.
    x = x_ref[...]
    o_ref[...] = jnp.swapaxes(x, 1, 2).reshape(o_ref.shape)


def _choose_bq(cpg, g, hw, itemsize, target_in_bytes, sub):
    """Pick the channels-per-group block size Bq."""
    bq_cap = max(1, target_in_bytes // max(1, g * hw * itemsize))
    if cpg <= bq_cap:
        return cpg  # whole cpg fits -> block dims equal full array dims.
    # Prefer a divisor of cpg that is a multiple of the sublane packing.
    for cand in range(min(bq_cap, cpg), 0, -1):
        if cpg % cand == 0 and cand % sub == 0:
            return cand
    # Fall back to a sublane-aligned size with a (masked) tail block.
    bq = (bq_cap // sub) * sub
    return bq if bq > 0 else cpg


def shuffle_block(x: jax.Array, groups: int) -> jax.Array:
    """Channel shuffle, equivalent to the PyTorch ShuffleBlock.forward."""
    N, C, H, W = x.shape
    g = int(groups)
    assert C % g == 0, "channels must be divisible by groups"
    cpg = C // g
    hw = H * W
    itemsize = x.dtype.itemsize

    # dtype-aware sublane packing: 8 for f32, 16 for bf16, 32 for int8/fp8.
    sub = max(8, 32 // itemsize)

    # Target block size per generation: ~2 MiB on v7x (64 MiB VMEM),
    # ~4 MiB on v5e/v6e (128 MiB VMEM).
    try:
        vmem_cap = pltpu.get_tpu_info().vmem_capacity_bytes
    except Exception:  # pragma: no cover - conservative fallback
        vmem_cap = 64 * 1024 * 1024
    target_in_bytes = (4 << 20) if vmem_cap >= (100 << 20) else (2 << 20)

    bq = _choose_bq(cpg, g, hw, itemsize, target_in_bytes, sub)
    n_qb = pl.cdiv(cpg, bq)

    # Lane-dense, contiguous views (free metadata reshapes).
    x_in = x.reshape(N, g, cpg, hw)          # source: g strided channel stripes
    out_shape = jax.ShapeDtypeStruct((N, C, hw), x.dtype)  # dest: contiguous channels

    in_block = (1, g, bq, hw)
    out_block = (1, bq * g, hw)

    # dtype-aware VMEM budget: double-buffered input + output blocks, padded
    # to the hardware (sublane, lane) tile, plus headroom; capped for v7x.
    def _pad(v, m):
        return ((v + m - 1) // m) * m

    lane_p = _pad(hw, 128)
    in_block_bytes = g * _pad(bq, sub) * lane_p * itemsize
    out_block_bytes = _pad(bq * g, sub) * lane_p * itemsize
    vmem_limit = 2 * (in_block_bytes + out_block_bytes) + (4 << 20)
    vmem_limit = max(vmem_limit, 8 << 20)
    vmem_limit = min(vmem_limit, 48 << 20)

    out3 = pl.pallas_call(
        _shuffle_kernel,
        out_shape=out_shape,
        grid=(N, n_qb),
        in_specs=[pl.BlockSpec(in_block, lambda n, qb: (n, 0, qb, 0))],
        out_specs=pl.BlockSpec(out_block, lambda n, qb: (n, qb, 0)),
        compiler_params=pltpu.CompilerParams(
            dimension_semantics=("parallel", "parallel"),
            vmem_limit_bytes=vmem_limit,
        ),
    )(x_in)

    return out3.reshape(N, C, H, W)


def shuffle_block_ref(x: jax.Array, groups: int) -> jax.Array:
    """Pure-JAX reference mirroring the PyTorch view/permute/view sequence."""
    N, C, H, W = x.shape
    g = groups
    return (
        x.reshape(N, g, C // g, H, W)
        .transpose(0, 2, 1, 3, 4)
        .reshape(N, C, H, W)
    )


if __name__ == "__main__":
    key = jax.random.PRNGKey(0)
    k1, k2 = jax.random.split(key)

    # Primary small test consistent with the module.
    x1 = jax.random.normal(k1, (2, 4, 16, 16), dtype=jnp.float32)
    out1 = jax.block_until_ready(shuffle_block(x1, groups=2))
    ref1 = shuffle_block_ref(x1, groups=2)
    assert out1.shape == ref1.shape and out1.dtype == ref1.dtype
    assert jnp.array_equal(out1, ref1), "Pallas channel shuffle mismatch (16x16)"

    # Lane-tail test: H*W = 196 (not a multiple of 128), groups=3.
    x2 = jax.random.normal(k2, (1, 6, 14, 14), dtype=jnp.float32)
    out2 = jax.block_until_ready(shuffle_block(x2, groups=3))
    ref2 = shuffle_block_ref(x2, groups=3)
    assert jnp.array_equal(out2, ref2), "Pallas channel shuffle mismatch (14x14)"

    print("KERNEL_OK")
</pallas_src>

<mosaic_0001>
module attributes {stable_mosaic.version = 11 : i64} {
  func.func @_shuffle_kernel(%arg0: i32, %arg1: i32, %arg2: memref<1x2x2x256xf32, #tpu.memory_space<vmem>>, %arg3: memref<1x4x256xf32, #tpu.memory_space<vmem>>) attributes {dimension_semantics = [#tpu.dimension_semantics<parallel>, #tpu.dimension_semantics<parallel>], iteration_bounds = array<i64: 2, 1>, scalar_prefetch = 0 : i64, scratch_operands = 0 : i64, tpu.core_type = #tpu.core_type<tc>, window_params = [{transform_indices = @transform_0, window_bounds = array<i64: 1, 2, 2, 256>}, {transform_indices = @transform_1, window_bounds = array<i64: 1, 4, 256>}]} {
    %c0 = arith.constant 0 : index
    %c0_0 = arith.constant 0 : index
    %c0_1 = arith.constant 0 : index
    %c0_2 = arith.constant 0 : index
    %0 = vector.load %arg2[%c0, %c0_0, %c0_1, %c0_2] : memref<1x2x2x256xf32, #tpu.memory_space<vmem>>, vector<1x2x2x256xf32>
    %1 = tpu.transpose %0, [0, 2, 1, 3] : vector<1x2x2x256xf32> -> vector<1x2x2x256xf32>
    %2 = vector.shape_cast %1 : vector<1x2x2x256xf32> to vector<1x4x256xf32>
    %c0_3 = arith.constant 0 : index
    %c0_4 = arith.constant 0 : index
    %c0_5 = arith.constant 0 : index
    %3 = vector.load %arg3[%c0_3, %c0_4, %c0_5] : memref<1x4x256xf32, #tpu.memory_space<vmem>>, vector<1x4x256xf32>
    tpu.vector_store %arg3[%c0_3, %c0_4, %c0_5], %2 {strides = array<i32>} : memref<1x4x256xf32, #tpu.memory_space<vmem>>, vector<1x4x256xf32>,
    return
  }
  func.func @transform_0(%arg0: i32, %arg1: i32) -> (i32, i32, i32, i32) {
    %c0_i32 = arith.constant 0 : i32
    %c0_i32_0 = arith.constant 0 : i32
    %c0_i32_1 = arith.constant 0 : i32
    return %arg0, %c0_i32, %arg1, %c0_i32_0 : i32, i32, i32, i32
  }
  func.func @transform_1(%arg0: i32, %arg1: i32) -> (i32, i32, i32) {
    %c0_i32 = arith.constant 0 : i32
    %c0_i32_0 = arith.constant 0 : i32
    return %arg0, %arg1, %c0_i32 : i32, i32, i32
  }
}

</mosaic_0001>

<bundles_post_ra>
// kernel: tpu_custom_call.1
= control target key start
LH: loop header
LB: loop body
LE: loop exit
PB: predicated region body
PF: predicated region fallthrough
CT: control target
= control target key end

     0   :  { %6 = vsyncpa [#allocation3], 0  ;;  %s665_s0 = inlined_call_operand.hbm [shape: f32[2,2,2,256], index: 0, kind: input, shape index: {}]   ;;  %s666_s1 = inlined_call_operand.hbm [shape: f32[2,4,256], index: 1, kind: output, shape index: {}]  }
   0x1   :  { %8 = vsyncpa [#allocation3 + $0x1], 0 }
   0x2   :  { %9 = vsyncpa [#allocation4], 0 }
   0x3   :  { %11 = vsyncpa [#allocation4 + $0x1], 0  ;;  %s492_s6 = smov 0   ;;  %s494_s7 = smov 0  }
   0x4   :  { %s496_s8 = smov 0   ;;  %s498_s9 = smov 0  }
   0x5   :  { %s500_s10 = smov 0   ;;  %s502_s11 = smov 0  }
   0x6 LB: > { %s277_s12 = sadd.s32 4294967295, %s475_s11   ;;  %s278_s13 = sadd.s32 4294967294, %s475_s11   ;;  %s475_s11 = sphi %s502_s11, %s17_s11   ;;  %s471_s10 = sphi %s500_s10, %s681_s10   ;;  %s467_s9 = sphi %s498_s9, %s680_s9   ;;  %s463_s8 = sphi %s496_s8, %s679_s8   ;;  %s459_s7 = sphi %s494_s7, %s678_s7   ;;  %s455_s6 = sphi %s492_s6, %s677_s6  }
   0x7   : > { %s29_s14 = sadd.s32 1, %s471_s10  ;;  %s38_s15 = sadd.s32 1, %s463_s8 }
   0x8   : > { %p31_p0 = scmp.ge.s32.totalorder %s29_s14, 2  ;;  %p45_p1 = scmp.ne.s32.totalorder %s463_s8, %s459_s7 }
   0x9   : > { %p46_p2 = scmp.eq.s32.totalorder %s475_s11, 0  ;;  %p51_p3 = scmp.ne.s32.totalorder %s459_s7, %s455_s6 }
   0xa   : > { %s683_s14 = smov (%p31_p0, %s29_s14), 0  ;;  %p52_p5 = scmp.eq.s32.totalorder %s277_s12, 0 }
   0xb   : > { %p533_p4 = por %p46_p2, %p45_p1  ;;  %s33_s17 = ssub.s32 %s471_s10, %s683_s14 }
   0xc   : > { %p77_p6 = scmp.eq.s32.totalorder %s277_s12, 1  ;;  %p36_p7 = scmp.eq.s32.totalorder %s33_s17, 0 }
   0xd   : > { %p539_p8 = por %p52_p5, %p51_p3  ;;  %p83_p10 = scmp.eq.s32.totalorder %s278_s13, 1 }
   0xe   : > { %p543_p9 = por %p77_p6, %p45_p1  ;;  %p307_p13 = scmp.lt.s32.totalorder %s475_s11, 2 }
   0xf   : > { %s548_s20 = scalar_select %p36_p7, %s463_s8, %s38_s15  }
  0x10   : > { %s670_s19 = scalar_select %p543_p9, 1, 0 }
  0x11   : > { %p550_p11 = por %p83_p10, %p51_p3  ;;  %s103_s22 = sand.u32 1, %s463_s8  }
  0x12   : > { %s281_s23 = sshll.u32 %s103_s22, 3  ;;  %s293_s24 = sshll.u32 %s471_s10, 7 }
  0x13   : > { %s671_s21 = scalar_select %p550_p11, 1, 0 }
  0x14   : > { %s561_s27 = scalar_lea.hbm %s665_s0, %s293_s24  ;;  %s107_s28 = scalar_lea.vmem [#allocation2], %s281_s23 }
  0x15   : > { %s116_s29 = sshll.u32 %s107_s28, 4  ;;  %p567_p0 = pnand %p307_p13, %p533_p4  ;;  %s563_s29 = int_to_ptr.vmem [resolvable:$true] %s116_s29 }
  0x16   : > { %s572_s2 = scalar_lea.sflag [#allocation3], %s103_s22  ;;  %s363_s3 = scalar_lea.hbm %s561_s27, 128 }
  0x17   : > { %p364_p2 = scmp.ne.s32.totalorder %s561_s27, %s363_s3  ;;  %p365_p3 = pneg %p567_p0 }
  0x18   : > { %s368_s12 = scalar_lea.hbm %s665_s0, 256  ;;  %p369_p4 = scmp.lt.u32.totalorder %s561_s27, %s665_s0 }
  0x19   : > { %p366_p5 = pnand %p365_p3, %p364_p2  ;;  %p370_p7 = scmp.lt.u32.totalorder %s368_s12, %s363_s3 }
  0x1a   : > { %p372_p13 = scmp.lt.u32.totalorder %s363_s3, %s561_s27 }
  0x1b   : > { %p367_p6 = pneg %p366_p5  ;;  %p371_p10 = por %p370_p7, %p369_p4 }
  0x1d   : > { %p373_p12 = por %p372_p13, %p371_p10 }
  0x1f   : > { %p374_p1 = pnand %p373_p12, %p367_p6 }
  0x21   : > { %377 = shalt.err (!%p374_p1)
}
  0x22   : > { %s378_s16 = scalar_lea.vmem %s563_s29, 128  ;;  %s477_s17 = smov [#allocation2]  }
  0x23   : > { %p379_p2 = scmp.ne.s32.totalorder %s563_s29, %s378_s16  ;;  %s383_s22 = sshll.u32 %s477_s17, 4  ;;  %s384_s22 = int_to_ptr.vmem [resolvable:$false] %s383_s22 }
  0x24   : > { %s385_s23 = scalar_lea.vmem %s384_s22, 256  ;;  %p386_p9 = scmp.lt.s32.totalorder %s563_s29, %s384_s22 }
  0x25   : > { %p381_p5 = pnand %p379_p2, %p365_p3  ;;  %p387_p4 = scmp.lt.s32.totalorder %s385_s23, %s378_s16 }
  0x27   : > { %p382_p11 = pneg %p381_p5  ;;  %p388_p7 = por %p387_p4, %p386_p9 }
  0x29   : > { %p389_p10 = pnand %p388_p7, %p382_p11 }
  0x2b   : > { %392 = shalt.err (!%p389_p10)
}
  0x2c   : > { %s478_s24 = smov 64   ;;  %s479_s25 = smov 4  }
  0x2d   : > { %302 = dma.hbm_to_vmem [thread:$0]  (!%p567_p0), %s561_s27, 128, %s563_s29, %s572_s2, %s478_s24, %s478_s24, %s479_s25  }
  0x2e   : > { %p124_p12 = scmp.lt.s32.totalorder %s475_s11, 3  ;;  %p673_p1 = scmp.ge.s32.totalorder %s475_s11, 1 }
  0x30   : > { %p125_p3 = pnand %p673_p1, %p124_p12 }
  0x31   : > { %s604_s26 = sand.u32 (!%p125_p3), 1, %s459_s7  }
  0x32   : > { %128 = sbr.rel (%p125_p3) target bundleno = 84 (0x54), region = 24  ;;  %s285_s28 = sshll.u32 (!%p125_p3), %s604_s26, 3 }
  0x33   : > { %s131_s3 = scalar_lea.sflag (!%p125_p3), [#allocation3], %s604_s26  ;;  %s134_s4 = scalar_lea.vmem (!%p125_p3), [#allocation2], %s285_s28 }
  0x39   : > { %446 = dma.done.wait (%p539_p8), %s131_s3, 128  }
  0x3a   : > { %448 = vsyncadd (%p539_p8), %s131_s3, 4294967168  ;;  %v362_v0 = vld.sshfl [vmem:[%s134_s4] sm:$0xff pattern:$0x73516240]  ;;  %s152_s27 = scalar_lea.vmem [#allocation5], %s285_s28  ;;  %s294_s30 = sshll.u32 %s467_s9, 7 }
  0x3b   : > { %s193_s29 = sshll.u32 %s152_s27, 4  ;;  %v480_v1 = vmov 0.0   ;;  %s618_s18 = scalar_lea.hbm %s666_s1, %s294_s30  ;;  %s613_s29 = int_to_ptr.vmem [resolvable:$true] %s193_s29 }
  0x3c   : > { %v163_v2 = vcombine.high %v362_v0, %v480_v1  ;;  %s177_s12 = scalar_lea.sflag [#allocation4], %s604_s26  ;;  %s393_s13 = scalar_lea.vmem %s613_s29, 128 }
  0x3d   : > { %p394_p8 = scmp.ne.s32.totalorder %s613_s29, %s393_s13  ;;  %p674_p9 = scmp.ne.s32.totalorder %s670_s19, 0 }
  0x3e   : > { %v166_v3 = vcombine.low %v362_v0, %v163_v2  ;;  %s481_s9 = smov [#allocation5]  }
  0x3f   : > { %p395_p11 = pnand %p394_p8, %p674_p9  ;;  %s397_s15 = sshll.u32 %s481_s9, 4  ;;  %s398_s15 = int_to_ptr.vmem [resolvable:$false] %s397_s15 }
  0x40   : > { %287 = vst.sshfl [vmem:[%s152_s27] sm:$0xff pattern:$0x76325410] %v166_v3  ;;  %s399_s16 = scalar_lea.vmem %s398_s15, 256  ;;  %p400_p6 = scmp.lt.s32.totalorder %s613_s29, %s398_s15 }
  0x41   : > { %p396_p0 = pneg %p395_p11  ;;  %p401_p13 = scmp.lt.s32.totalorder %s399_s16, %s393_s13 }
  0x43   : > { %p402_p2 = por %p401_p13, %p400_p6 }
  0x45   : > { %p403_p5 = pnand %p402_p2, %p396_p0 }
  0x47   : > { %406 = shalt.err (!%p403_p5)
}
  0x48   : > { %s407_s17 = scalar_lea.hbm %s618_s18, 128  ;;  %s411_s24 = scalar_lea.hbm %s666_s1, 256 }
  0x49   : > { %p408_p4 = scmp.ne.s32.totalorder %s618_s18, %s407_s17  ;;  %p412_p12 = scmp.lt.u32.totalorder %s618_s18, %s666_s1 }
  0x4a   : > { %p413_p1 = scmp.lt.u32.totalorder %s411_s24, %s407_s17  ;;  %p415_p8 = scmp.lt.u32.totalorder %s407_s17, %s618_s18 }
  0x4b   : > { %p409_p7 = pnand %p408_p4, %p674_p9 }
  0x4c   : > { %p414_p3 = por %p413_p1, %p412_p12 }
  0x4d   : > { %p410_p10 = pneg %p409_p7 }
  0x4e   : > { %p416_p11 = por %p415_p8, %p414_p3 }
  0x50   : > { %p417_p0 = pnand %p416_p11, %p410_p10 }
  0x52   : > { %420 = shalt.err (!%p417_p0)
}
  0x53   : > { %297 = dma.vmem_to_hbm [thread:$0]  (%p674_p9), %s613_s29, 128, %s618_s18, %s177_s12  }
  0x54 PF: > { %s205_s28 = sand.u32 1, %s455_s6   ;;  %p675_p6 = scmp.ne.s32.totalorder %s671_s21, 0 }
  0x55   : > { %p676_p13 = scmp.ge.s32.totalorder %s475_s11, 2  ;;  %s206_s3 = scalar_lea.sflag [#allocation4], %s205_s28 }
  0x57   : > { %p304_p2 = pnand %p676_p13, %p675_p6 }
  0x59   : > { %450 = dma.done.wait (!%p304_p2), %s206_s3, 128  }
  0x5a   : > { %452 = vsyncadd (!%p304_p2), %s206_s3, 4294967168  ;;  %s17_s11 = sadd.s32 1, %s475_s11   ;;  %s677_s6 = smov %s459_s7 }
  0x5b   : > { %p14_p5 = scmp.ge.s32.totalorder %s17_s11, 4   ;;  %s678_s7 = smov %s463_s8 }
  0x5c   : > { %s679_s8 = smov %s548_s20  ;;  %s680_s9 = smov %s471_s10 }
  0x5d   : > { %s681_s10 = smov %s683_s14  ;;  %16 = sbr.rel (!%p14_p5) target bundleno = 6 (0x6), region = 69 }
  0x64   :  { %211 = vsyncpa [#allocation3], 1 }
  0x65   :  { %213 = vsyncpa [#allocation3 + $0x1], 1 }
  0x66   :  { %214 = vsyncpa [#allocation4], 1 }
  0x67   :  { %216 = vsyncpa [#allocation4 + $0x1], 1 }

</bundles_post_ra>
